<compile_context>
chip_gen: v7x
topology: tpu7x:2x2x1
jax: 0.10.0
libtpu: 0.0.40
codegen_flags: <defaults>
</compile_context>

<pallas_src>
import functools

import jax
import jax.numpy as jnp
from jax.experimental import pallas as pl
from jax.experimental.pallas import tpu as pltpu


def _round_up(x, m):
    return ((x + m - 1) // m) * m


def actor_critic_kernel(x_ref, w1_ref, b1_ref, wh_ref, bh_ref, sel_ref, neg_ref,
                        out_ref):
    # Shared hidden layer: relu(x @ W1 + b1).  x is streamed as bf16; upcast
    # once and accumulate in f32 on the MXU.
    x = x_ref[...].astype(jnp.float32)
    h = jnp.dot(x, w1_ref[...], preferred_element_type=jnp.float32) + b1_ref[...]
    h = jnp.maximum(h, 0.0)

    # Fused actor+critic heads: a single MXU push.  y[:, :A] = policy logits,
    # y[:, A] = critic value, lanes > A are zero padding.
    y = jnp.dot(h, wh_ref[...], preferred_element_type=jnp.float32) + bh_ref[...]

    # Numerically stable softmax over the action lanes only.  neg_ref is a
    # resident (1, 128) additive mask (0 on action lanes, -1e30 on pad lanes)
    # broadcast over the batch tile -- no (tile_b, 128) iota temporaries.
    logits = y + neg_ref[...]
    m = jnp.max(logits, axis=-1, keepdims=True)
    e = jnp.exp(logits - m)                       # pad lanes -> exp(-huge) = 0
    denom = jnp.sum(e, axis=-1, keepdims=True)
    policy = e / denom                            # exact divide: rows sum to 1

    # Lane-dense output slab: policy on lanes [0, A), raw head output (value at
    # lane A, zeros beyond) elsewhere.  One unmasked 128-lane store.
    sel = sel_ref[...]                            # (1, 128) 0/1 mask, broadcast
    out_ref[...] = (policy * sel + y * (1.0 - sel)).astype(out_ref.dtype)


def prepare_params(params):
    """One-time fusion of the policy/value heads into a lane-dense [H, 128]
    block plus the resident softmax/select masks.  Call ONCE at init (it is a
    handful of small XLA ops), never per step."""
    wp, bp = params["wp"], params["bp"]
    wv, bv = params["wv"], params["bv"]
    H, A = wp.shape
    head_pad = _round_up(A + 1, 128)
    wh = (jnp.zeros((H, head_pad), jnp.float32)
          .at[:, :A].set(wp).at[:, A:A + 1].set(wv))
    bh = (jnp.zeros((1, head_pad), jnp.float32)
          .at[:, :A].set(bp[0]).at[:, A:A + 1].set(bv[0]))
    lane = jnp.arange(head_pad)[None, :]
    sel = (lane < A).astype(jnp.float32)          # 1 on action lanes, else 0
    neg = (sel - 1.0) * 1e30                      # 0 on action lanes, -1e30 on pad
    return {"w1": params["w1"], "b1": params["b1"],
            "wh": wh, "bh": bh, "sel": sel, "neg": neg}


@functools.partial(jax.jit,
                   static_argnames=("num_actions", "tile_b", "x_dtype",
                                    "out_dtype"))
def actor_critic_forward(x, prepared, *, num_actions, tile_b=2048,
                         x_dtype=jnp.bfloat16, out_dtype=jnp.float32):
    """x: [B, state_dim] float32.  prepared: output of prepare_params()."""
    B, S = x.shape
    H = prepared["w1"].shape[1]
    head_pad = prepared["wh"].shape[1]

    # Stream x as bf16 (halves input HBM bytes); kernel accumulates in f32.
    x_in = x.astype(x_dtype)

    # Batch tile: multiple of 8, large enough to amortize the ~0.35 us
    # grid-step overhead, but no larger than half the batch so the "parallel"
    # grid axis has >= 2 steps to shard across v7x's two TensorCores.
    # Per-step VMEM (~2*tile_b*(S+128)*4 B + <100 KiB resident weights) is far
    # below every generation's scoped-VMEM budget, so no VMEM cap is needed.
    half = _round_up(-(-B // 2), 8)
    tile_b = max(8, min(_round_up(tile_b, 8), half))
    b_pad = _round_up(B, tile_b)
    if b_pad != B:
        x_in = jnp.pad(x_in, ((0, b_pad - B), (0, 0)))
    grid = (b_pad // tile_b,)

    # Weights/biases/masks: constant index_map -> fetched once, VMEM-resident.
    resident = lambda arr: pl.BlockSpec(arr.shape, lambda i: (0, 0))

    cost = pl.CostEstimate(
        flops=2 * b_pad * S * H + 2 * b_pad * H * head_pad,
        transcendentals=b_pad * head_pad,
        bytes_accessed=(b_pad * S * jnp.dtype(x_dtype).itemsize
                        + b_pad * head_pad * jnp.dtype(out_dtype).itemsize
                        + sum(int(v.size) * 4 for v in prepared.values())),
    )

    out = pl.pallas_call(
        actor_critic_kernel,
        out_shape=jax.ShapeDtypeStruct((b_pad, head_pad), out_dtype),
        grid=grid,
        in_specs=[
            pl.BlockSpec((tile_b, S), lambda i: (i, 0)),   # x: streamed over B
            resident(prepared["w1"]),
            resident(prepared["b1"]),
            resident(prepared["wh"]),
            resident(prepared["bh"]),
            resident(prepared["sel"]),
            resident(prepared["neg"]),
        ],
        out_specs=pl.BlockSpec((tile_b, head_pad), lambda i: (i, 0)),
        compiler_params=pltpu.CompilerParams(
            dimension_semantics=("parallel",),             # shard B over TCs
        ),
        cost_estimate=cost,
    )(x_in, prepared["w1"], prepared["b1"], prepared["wh"], prepared["bh"],
      prepared["sel"], prepared["neg"])

    # Lazy slices: this function is jitted, so these fuse with the consumer and
    # do not cause extra HBM passes over the output slab.
    policy = out[:B, :num_actions]
    value = out[:B, num_actions:num_actions + 1]
    return policy, value


def init_params(key, state_dim, num_hidden_units, num_actions):
    """Deterministic init mimicking PyTorch Linear default: U(-1/sqrt(fan_in), +)."""
    def linear(key, fan_in, fan_out):
        kw, kb = jax.random.split(key)
        bound = 1.0 / jnp.sqrt(fan_in)
        w = jax.random.uniform(kw, (fan_in, fan_out), jnp.float32, -bound, bound)
        b = jax.random.uniform(kb, (1, fan_out), jnp.float32, -bound, bound)
        return w, b

    k1, k2, kp, kv = jax.random.split(key, 4)
    w1, b1 = linear(k1, state_dim, num_hidden_units)
    # layer2 is created by the module but unused in forward(); kept for parity.
    w2, b2 = linear(k2, num_hidden_units, num_hidden_units)
    wp, bp = linear(kp, num_hidden_units, num_actions)
    wv, bv = linear(kv, num_hidden_units, 1)
    return {"w1": w1, "b1": b1, "w2": w2, "b2": b2,
            "wp": wp, "bp": bp, "wv": wv, "bv": bv}


if __name__ == "__main__":
    # Small shapes consistent with the module's forward.
    batch = 8
    state_dim = 16
    num_hidden_units = 32
    num_actions = 8

    key = jax.random.PRNGKey(0)
    kx, kparams = jax.random.split(key)

    x = jax.random.normal(kx, (batch, state_dim), dtype=jnp.float32)
    params = init_params(kparams, state_dim, num_hidden_units, num_actions)
    prepared = prepare_params(params)      # one-time head fusion + masks

    policy, value = actor_critic_forward(x, prepared, num_actions=num_actions)
    jax.block_until_ready((policy, value))

    assert policy.shape == (batch, num_actions)
    assert value.shape == (batch, 1)

    # Tight check against a reference using the same bf16 rounding of x
    # (isolates kernel correctness from the deliberate bf16 streaming).
    xb = x.astype(jnp.bfloat16).astype(jnp.float32)
    h_b = jnp.maximum(xb @ params["w1"] + params["b1"], 0.0)
    policy_b = jax.nn.softmax(h_b @ params["wp"] + params["bp"], axis=-1)
    value_b = h_b @ params["wv"] + params["bv"]
    assert jnp.allclose(policy, policy_b, atol=1e-4, rtol=1e-4)
    assert jnp.allclose(value, value_b, atol=1e-4, rtol=1e-4)

    # Loose check against the full-f32 module semantics (only x is bf16-rounded).
    h_f = jnp.maximum(x @ params["w1"] + params["b1"], 0.0)
    policy_f = jax.nn.softmax(h_f @ params["wp"] + params["bp"], axis=-1)
    value_f = h_f @ params["wv"] + params["bv"]
    assert jnp.allclose(policy, policy_f, atol=2e-2, rtol=2e-2)
    assert jnp.allclose(value, value_f, atol=2e-2, rtol=2e-2)

    # Exact-divide softmax: rows sum to 1 to f32 precision.
    assert jnp.allclose(jnp.sum(policy, axis=-1), 1.0, atol=1e-5)

    print("KERNEL_OK")
</pallas_src>

<mosaic_0001>
module attributes {stable_mosaic.version = 11 : i64} {
  func.func @actor_critic_kernel(%arg0: i32, %arg1: memref<8x16xbf16, #tpu.memory_space<vmem>>, %arg2: memref<16x32xf32, #tpu.memory_space<vmem>>, %arg3: memref<1x32xf32, #tpu.memory_space<vmem>>, %arg4: memref<32x128xf32, #tpu.memory_space<vmem>>, %arg5: memref<1x128xf32, #tpu.memory_space<vmem>>, %arg6: memref<1x128xf32, #tpu.memory_space<vmem>>, %arg7: memref<1x128xf32, #tpu.memory_space<vmem>>, %arg8: memref<8x128xf32, #tpu.memory_space<vmem>>) attributes {dimension_semantics = [#tpu.dimension_semantics<parallel>], iteration_bounds = array<i64: 1>, scalar_prefetch = 0 : i64, scratch_operands = 0 : i64, tpu.core_type = #tpu.core_type<tc>, window_params = [{transform_indices = @transform_0, window_bounds = array<i64: 8, 16>}, {pipeline_mode = #tpu.pipeline_mode<synchronous>, transform_indices = @transform_1, window_bounds = array<i64: 16, 32>}, {pipeline_mode = #tpu.pipeline_mode<synchronous>, transform_indices = @transform_2, window_bounds = array<i64: 1, 32>}, {pipeline_mode = #tpu.pipeline_mode<synchronous>, transform_indices = @transform_3, window_bounds = array<i64: 32, 128>}, {pipeline_mode = #tpu.pipeline_mode<synchronous>, transform_indices = @transform_4, window_bounds = array<i64: 1, 128>}, {pipeline_mode = #tpu.pipeline_mode<synchronous>, transform_indices = @transform_5, window_bounds = array<i64: 1, 128>}, {pipeline_mode = #tpu.pipeline_mode<synchronous>, transform_indices = @transform_6, window_bounds = array<i64: 1, 128>}, {transform_indices = @transform_7, window_bounds = array<i64: 8, 128>}]} {
    %c0 = arith.constant 0 : index
    %c0_0 = arith.constant 0 : index
    %0 = vector.load %arg1[%c0, %c0_0] : memref<8x16xbf16, #tpu.memory_space<vmem>>, vector<8x16xbf16>
    %1 = arith.extf %0 : vector<8x16xbf16> to vector<8x16xf32>
    %c0_1 = arith.constant 0 : index
    %c0_2 = arith.constant 0 : index
    %2 = vector.load %arg2[%c0_1, %c0_2] : memref<16x32xf32, #tpu.memory_space<vmem>>, vector<16x32xf32>
    %cst = arith.constant dense<0.000000e+00> : vector<8x32xf32>
    %3 = tpu.matmul %1, %2, %cst {dimension_numbers = #tpu.dot_dimension_numbers<[1], [0], [0], [1], [0, 0, 1, 1], [], []>} : vector<8x16xf32>, vector<16x32xf32>, vector<8x32xf32> -> vector<8x32xf32>
    %c0_3 = arith.constant 0 : index
    %c0_4 = arith.constant 0 : index
    %4 = vector.load %arg3[%c0_3, %c0_4] : memref<1x32xf32, #tpu.memory_space<vmem>>, vector<1x32xf32>
    %5 = vector.broadcast %4 : vector<1x32xf32> to vector<8x32xf32>
    %6 = arith.addf %3, %5 : vector<8x32xf32>
    %cst_5 = arith.constant 0.000000e+00 : f32
    %7 = vector.broadcast %cst_5 : f32 to vector<8x32xf32>
    %8 = arith.maximumf %6, %7 : vector<8x32xf32>
    %c0_6 = arith.constant 0 : index
    %c0_7 = arith.constant 0 : index
    %9 = vector.load %arg4[%c0_6, %c0_7] : memref<32x128xf32, #tpu.memory_space<vmem>>, vector<32x128xf32>
    %cst_8 = arith.constant dense<0.000000e+00> : vector<8x128xf32>
    %10 = tpu.matmul %8, %9, %cst_8 {dimension_numbers = #tpu.dot_dimension_numbers<[1], [0], [0], [1], [0, 0, 1, 1], [], []>} : vector<8x32xf32>, vector<32x128xf32>, vector<8x128xf32> -> vector<8x128xf32>
    %c0_9 = arith.constant 0 : index
    %c0_10 = arith.constant 0 : index
    %11 = vector.load %arg5[%c0_9, %c0_10] : memref<1x128xf32, #tpu.memory_space<vmem>>, vector<1x128xf32>
    %12 = vector.broadcast %11 : vector<1x128xf32> to vector<8x128xf32>
    %13 = arith.addf %10, %12 : vector<8x128xf32>
    %c0_11 = arith.constant 0 : index
    %c0_12 = arith.constant 0 : index
    %14 = vector.load %arg7[%c0_11, %c0_12] : memref<1x128xf32, #tpu.memory_space<vmem>>, vector<1x128xf32>
    %15 = vector.broadcast %14 : vector<1x128xf32> to vector<8x128xf32>
    %16 = arith.addf %13, %15 : vector<8x128xf32>
    %cst_13 = arith.constant dense<0xFF800000> : vector<8xf32>
    %17 = vector.multi_reduction <maximumf>, %16, %cst_13 [1] : vector<8x128xf32> to vector<8xf32>
    %18 = vector.shape_cast %17 : vector<8xf32> to vector<8x1xf32>
    %19 = vector.broadcast %18 : vector<8x1xf32> to vector<8x128xf32>
    %20 = arith.subf %16, %19 : vector<8x128xf32>
    %21 = math.exp %20 : vector<8x128xf32>
    %cst_14 = arith.constant dense<0.000000e+00> : vector<8xf32>
    %22 = vector.multi_reduction <add>, %21, %cst_14 [1] : vector<8x128xf32> to vector<8xf32>
    %23 = vector.shape_cast %22 : vector<8xf32> to vector<8x1xf32>
    %24 = vector.broadcast %23 : vector<8x1xf32> to vector<8x128xf32>
    %25 = arith.divf %21, %24 : vector<8x128xf32>
    %c0_15 = arith.constant 0 : index
    %c0_16 = arith.constant 0 : index
    %26 = vector.load %arg6[%c0_15, %c0_16] : memref<1x128xf32, #tpu.memory_space<vmem>>, vector<1x128xf32>
    %27 = vector.broadcast %26 : vector<1x128xf32> to vector<8x128xf32>
    %28 = arith.mulf %25, %27 : vector<8x128xf32>
    %cst_17 = arith.constant 1.000000e+00 : f32
    %29 = vector.broadcast %cst_17 : f32 to vector<1x128xf32>
    %30 = arith.subf %29, %26 : vector<1x128xf32>
    %31 = vector.broadcast %30 : vector<1x128xf32> to vector<8x128xf32>
    %32 = arith.mulf %13, %31 : vector<8x128xf32>
    %33 = arith.addf %28, %32 : vector<8x128xf32>
    %c0_18 = arith.constant 0 : index
    %c0_19 = arith.constant 0 : index
    %34 = vector.load %arg8[%c0_18, %c0_19] : memref<8x128xf32, #tpu.memory_space<vmem>>, vector<8x128xf32>
    tpu.vector_store %arg8[%c0_18, %c0_19], %33 {strides = array<i32>} : memref<8x128xf32, #tpu.memory_space<vmem>>, vector<8x128xf32>,
    return
  }
  func.func @transform_0(%arg0: i32) -> (i32, i32) {
    %c0_i32 = arith.constant 0 : i32
    %c0_i32_0 = arith.constant 0 : i32
    return %arg0, %c0_i32 : i32, i32
  }
  func.func @transform_1(%arg0: i32) -> (i32, i32) {
    %c0_i32 = arith.constant 0 : i32
    %c0_i32_0 = arith.constant 0 : i32
    %c0_i32_1 = arith.constant 0 : i32
    return %c0_i32, %c0_i32_0 : i32, i32
  }
  func.func @transform_2(%arg0: i32) -> (i32, i32) {
    %c0_i32 = arith.constant 0 : i32
    %c0_i32_0 = arith.constant 0 : i32
    %c0_i32_1 = arith.constant 0 : i32
    return %c0_i32, %c0_i32_0 : i32, i32
  }
  func.func @transform_3(%arg0: i32) -> (i32, i32) {
    %c0_i32 = arith.constant 0 : i32
    %c0_i32_0 = arith.constant 0 : i32
    %c0_i32_1 = arith.constant 0 : i32
    return %c0_i32, %c0_i32_0 : i32, i32
  }
  func.func @transform_4(%arg0: i32) -> (i32, i32) {
    %c0_i32 = arith.constant 0 : i32
    %c0_i32_0 = arith.constant 0 : i32
    %c0_i32_1 = arith.constant 0 : i32
    return %c0_i32, %c0_i32_0 : i32, i32
  }
  func.func @transform_5(%arg0: i32) -> (i32, i32) {
    %c0_i32 = arith.constant 0 : i32
    %c0_i32_0 = arith.constant 0 : i32
    %c0_i32_1 = arith.constant 0 : i32
    return %c0_i32, %c0_i32_0 : i32, i32
  }
  func.func @transform_6(%arg0: i32) -> (i32, i32) {
    %c0_i32 = arith.constant 0 : i32
    %c0_i32_0 = arith.constant 0 : i32
    %c0_i32_1 = arith.constant 0 : i32
    return %c0_i32, %c0_i32_0 : i32, i32
  }
  func.func @transform_7(%arg0: i32) -> (i32, i32) {
    %c0_i32 = arith.constant 0 : i32
    %c0_i32_0 = arith.constant 0 : i32
    return %arg0, %c0_i32 : i32, i32
  }
}

</mosaic_0001>

<bundles_post_ra>
// kernel: actor_critic_forward.1
= control target key start
LH: loop header
LB: loop body
LE: loop exit
PB: predicated region body
PF: predicated region fallthrough
CT: control target
= control target key end

     0   :  { %12 = vsyncpa [#allocation3], 0  ;;  %s512_s0 = inlined_call_operand.vmem [shape: bf16[8,16], index: 0, kind: input, shape index: {}]   ;;  %s513_s1 = inlined_call_operand.hbm [shape: f32[16,32], index: 1, kind: input, shape index: {}]   ;;  %s514_s2 = inlined_call_operand.vmem [shape: f32[1,32], index: 2, kind: input, shape index: {}]   ;;  %s515_s3 = inlined_call_operand.vmem [shape: f32[32,128], index: 3, kind: input, shape index: {}]   ;;  %s516_s4 = inlined_call_operand.vmem [shape: f32[1,128], index: 4, kind: input, shape index: {}]   ;;  %s517_s5 = inlined_call_operand.hbm [shape: f32[1,128], index: 5, kind: input, shape index: {}]   ;;  %s518_s6 = inlined_call_operand.hbm [shape: f32[1,128], index: 6, kind: input, shape index: {}]   ;;  %s519_s7 = inlined_call_operand.vmem [shape: f32[8,128], index: 7, kind: output, shape index: {}]  }
   0x1   :  { %13 = vsyncpa [#allocation5], 0  ;;  %s397_s24 = smov [#allocation4]   ;;  %s398_s26 = smov [#allocation2]  }
   0x2   :  { %s40_s25 = sshll.u32 %s397_s24, 4  ;;  %s21_s27 = sshll.u32 %s398_s26, 4  ;;  %s41_s25 = int_to_ptr.vmem [resolvable:$true] %s40_s25  ;;  %s445_s27 = int_to_ptr.vmem [resolvable:$true] %s21_s27 }
   0x3   :  { %s327_s30 = scalar_lea.hbm %s517_s5, 16 }
   0x4   :  { %p328_p0 = scmp.ne.s32.totalorder %s517_s5, %s327_s30  ;;  %p331_p1 = scmp.lt.u32.totalorder %s327_s30, %s517_s5 }
   0x6   :  { %p333_p2 = pnand %p331_p1, %p328_p0 }
   0x8   :  { %336 = shalt.err (!%p333_p2)
}
   0x9   :  { %s337_s12 = scalar_lea.vmem %s41_s25, 16  ;;  %s341_s13 = scalar_lea.vmem %s41_s25, 32 }
   0xa   :  { %p338_p3 = scmp.ne.s32.totalorder %s41_s25, %s337_s12  ;;  %p342_p4 = scmp.lt.s32.totalorder %s41_s25, %s41_s25 }
   0xb   :  { %p343_p5 = scmp.lt.s32.totalorder %s341_s13, %s337_s12 }
   0xd   :  { %p344_p6 = por %p343_p5, %p342_p4 }
   0xf   :  { %p345_p7 = pnand %p344_p6, %p338_p3 }
  0x11   :  { %348 = shalt.err (!%p345_p7)
}
  0x12   :  { %43 = dma.hbm_to_vmem [thread:$0]  %s517_s5, 16, %s41_s25, [#allocation5]  }
  0x13   :  { %s349_s18 = scalar_lea.hbm %s513_s1, 256 }
  0x14   :  { %p350_p8 = scmp.ne.s32.totalorder %s513_s1, %s349_s18  ;;  %p353_p9 = scmp.lt.u32.totalorder %s349_s18, %s513_s1 }
  0x16   :  { %p355_p10 = pnand %p353_p9, %p350_p8 }
  0x18   :  { %358 = shalt.err (!%p355_p10)
}
  0x19   :  { %s359_s23 = scalar_lea.vmem %s445_s27, 256  ;;  %p364_p12 = scmp.lt.s32.totalorder %s445_s27, %s445_s27 }
  0x1a   :  { %p360_p11 = scmp.ne.s32.totalorder %s445_s27, %s359_s23  ;;  %p365_p13 = scmp.lt.s32.totalorder %s359_s23, %s359_s23 }
  0x1c   :  { %p366_p0 = por %p365_p13, %p364_p12 }
  0x1e   :  { %p367_p1 = pnand %p366_p0, %p360_p11 }
  0x20   :  { %370 = shalt.err (!%p367_p1)
}
  0x21   :  { %s399_s5 = smov 128   ;;  %s400_s24 = smov 8  }
  0x22   :  { %27 = dma.hbm_to_vmem [thread:$0]  %s513_s1, 256, %s445_s27, [#allocation3], %s399_s5, %s399_s5, %s400_s24  }
  0x23   :  { %s401_s28 = smov [#allocation6]   ;;  %s371_s9 = scalar_lea.hbm %s518_s6, 16 }
  0x24   :  { %s50_s29 = sshll.u32 %s401_s28, 4  ;;  %p372_p2 = scmp.ne.s32.totalorder %s518_s6, %s371_s9  ;;  %s51_s29 = int_to_ptr.vmem [resolvable:$true] %s50_s29 }
  0x25   :  { %p375_p3 = scmp.lt.u32.totalorder %s371_s9, %s518_s6 }
  0x27   :  { %p377_p4 = pnand %p375_p3, %p372_p2 }
  0x29   :  { %380 = shalt.err (!%p377_p4)
}
  0x2a   :  { %s381_s14 = scalar_lea.vmem %s51_s29, 16  ;;  %s385_s1 = scalar_lea.vmem %s51_s29, 32 }
  0x2b   :  { %p382_p5 = scmp.ne.s32.totalorder %s51_s29, %s381_s14  ;;  %p386_p6 = scmp.lt.s32.totalorder %s51_s29, %s51_s29 }
  0x2c   :  { %p387_p7 = scmp.lt.s32.totalorder %s385_s1, %s381_s14 }
  0x2e   :  { %p388_p8 = por %p387_p7, %p386_p6 }
  0x30   :  { %p389_p9 = pnand %p388_p8, %p382_p5 }
  0x32   :  { %392 = shalt.err (!%p389_p9)
}
  0x33   :  { %53 = dma.hbm_to_vmem [thread:$0]  %s518_s6, 16, %s51_s29, [#allocation5]  }
  0x34   :  { %393 = dma.done.wait [#allocation3], 256  }
  0x35   :  { %394 = vsyncadd [#allocation3], 4294967040 }
  0x36   :  { %395 = dma.done.wait [#allocation5], 32  }
  0x37   :  { %396 = vsyncadd [#allocation5], 4294967264  ;;  %v402_v0 = vmov 0.0|0.0   ;;  %vm403_vm0 = vmmov 0   ;;  %v404_v1 = vmov 0.0   ;;  %v65_v2 = vld [vmem:[#allocation2] sm:$0xff]  ;;  %v253_v28 = vlaneseq }
  0x38   :  { %306 = vmatprep.subr.bf16.mxu0 %v402_v0  ;;  %292 = vmatprep.mubr.msk.f32.mxu0 %vm403_vm0, %v404_v1  ;;  %v66_v3 = vld [vmem:[#allocation2 + $0x8] sm:$0xff]  ;;  %v63_v4 = vld [vmem:[%s512_s0] sm:$0xf]  ;;  %v150_v7 = vld [vmem:[%s515_s3 + $0x8] sm:$0xff]  ;;  %vm74_vm1 = vcmask 130048   ;;  %vm160_vm2 = vcmask 261120  }
  0x39   :  { %309 = vmatprep.subr.bf16.mxu1 %v402_v0  ;;  %303 = vmatprep.mubr.msk.f32.mxu1 %vm403_vm0, %v404_v1  ;;  %v307_v5 = vpack.c.bf16 %v66_v3, %v65_v2  ;;  %v149_v6 = vld [vmem:[%s515_s3] sm:$0xff]  ;;  %v64_v8 = vunpack.c.l.bf16 %v63_v4  ;;  %v151_v10 = vld [vmem:[%s515_s3 + $0x10] sm:$0xff]  ;;  %v152_v11 = vld [vmem:[%s515_s3 + $0x18] sm:$0xff]  ;;  %v254_v30 = vshrl.u32 %v253_v28, 7 }
  0x3a   :  { %v310_v9 = vpack.c.bf16 %v150_v7, %v149_v6  ;;  %v313_v12 = vpack.c.bf16 %v152_v11, %v151_v10  ;;  %v275_v13 = vld [vmem:[%s514_s2] ss:$0 sm:$0xff]  ;;  %v279_v20 = vld [vmem:[#allocation6] ss:$0 sm:$0xff]  ;;  %v251_v31 = vld [vmem:[#allocation4] sm:$0x1] }
  0x3b   :  { %308 = vmatpush3.bf16.msra.mxu0 %v307_v5  ;;  %v277_v18 = vld [vmem:[%s516_s4] ss:$0 sm:$0xff]  ;;  %v255_v32 = vsub.s32 0, %v254_v30  ;;  %v259_v33 = vsub.f32 1.0, %v251_v31 }
  0x3c   :  { %311 = vmatpush3.bf16.msra.mxu1 %v310_v9 }
  0x3d   :  { %312 = vmatprep.subr.bf16.mxu1 %v402_v0  ;;  %v256_v34 = vrot.slane %v251_v31, %v255_v32  ;;  %v264_v35 = vrot.slane %v259_v33, %v255_v32 }
  0x3e   :  { %293 = vmatmul.mubr.msk.f32.vlgmr.msra.gmra.mrb[0].mxu0 %vm74_vm1, %v64_v8 }
  0x40   :  { %314 = vmatpush3.bf16.msra.mxu1 %v313_v12 }
 0x111   :  { %v144_v14 = vpop.f32.mrb[0].mxu0 }
 0x112   :  { %v145_v15 = vadd.f32 %v275_v13, %v144_v14  ;;  %v294_v16 = vpop.f32.mrb[1].mxu0 }
 0x114   :  { %v148_v17 = vmax.f32 %v145_v15, 0.0 }
 0x116   :  { %304 = vmatmul.mubr.msk.f32.vlgmr.msra.gmra.mrb[0].mxu1 %vm160_vm2, %v148_v17 }
 0x1e9   :  { %v230_v19 = vpop.f32.mrb[0].mxu1 }
 0x1ea   :  { %v231_v21 = vadd.f32 %v277_v18, %v230_v19  ;;  %v305_v22 = vpop.f32.mrb[1].mxu1 }
 0x1ec   :  { %v241_v23 = vadd.f32 %v279_v20, %v231_v21  ;;  %v266_v38 = vmul.f32 %v264_v35, %v231_v21 }
 0x1ee   :  { %242 = vmax.xlane.f32.xlu0 %v241_v23 }
 0x27b   :  { %v243_v24 = vpop.xlane.xlu0 %242 }
 0x27c   :  { %v244_v25 = vsub.f32 %v241_v23, %v243_v24 }
 0x27e   :  { %v245_v26 = vmul.f32 1.442695, %v244_v25 }
 0x280   :  { %323 = vpow2.f32 %v245_v26 }
 0x28a   :  { %v324_v27 = vpop.eup %323 }
 0x28b   :  { %247 = vadd.xlane.f32.xlu0 %v324_v27 }
 0x318   :  { %v248_v29 = vpop.xlane.xlu0 %247 }
 0x319   :  { %325 = vrcp.f32 %v248_v29 }
 0x323   :  { %v326_v36 = vpop.eup %325 }
 0x324   :  { %v250_v37 = vmul.f32 %v326_v36, %v324_v27 }
 0x326   :  { %v258_v39 = vmul.f32 %v256_v34, %v250_v37 }
 0x328   :  { %v267_v40 = vadd.f32 %v266_v38, %v258_v39 }
 0x32a   :  { %268 = vst [vmem:[%s519_s7] sm:$0xff] %v267_v40 }
 0x32b   :  { %273 = vsyncpa [#allocation3], 1 }
 0x32c   :  { %274 = vsyncpa [#allocation5], 1 }

</bundles_post_ra>
